<compile_context>
chip_gen: v7x
topology: tpu7x:2x2x1
jax: 0.10.0
libtpu: 0.0.40
codegen_flags: <defaults>
</compile_context>

<pallas_src>
import math

import jax
import jax.numpy as jnp
from jax.experimental import pallas as pl
from jax.experimental.pallas import tpu as pltpu


def _normhead_kernel(x_ref, w_ref, inv_ref, o_ref):
    # x_ref:   (tm, H)  activations tile (native dtype)
    # w_ref:   (tn, H)  raw weight rows tile (native dtype)
    # inv_ref: (1, tn)  precomputed f32  1 / max(||w_row||_2, 1e-12)
    # o_ref:   (tm, tn) logits tile
    acc = jax.lax.dot_general(
        x_ref[...], w_ref[...],
        dimension_numbers=(((1,), (1,)), ((), ())),   # contract hidden dims: x @ w.T
        preferred_element_type=jnp.float32)
    # Column-wise scaling of the f32 accumulator == matmul against normalized rows.
    o_ref[...] = (acc * inv_ref[...]).astype(o_ref.dtype)


def _round_up(x: int, n: int) -> int:
    return ((x + n - 1) // n) * n


def norm_head(hidden_states: jax.Array, weight: jax.Array,
              *, tm: int = 256, tn: int = 512) -> jax.Array:
    """hidden_states: [B, S, H], weight: [V, H] -> logits [B, S, V]."""
    b, s, h = hidden_states.shape
    v, h_w = weight.shape
    assert h == h_w
    m = b * s
    x2d = hidden_states.reshape(m, h)

    # Precompute 1/||w_row|| once (tiny V-length f32 vector; exact F.normalize clamp).
    w_f32 = weight.astype(jnp.float32)
    inv_norm = (1.0 / jnp.maximum(
        jnp.sqrt(jnp.sum(w_f32 * w_f32, axis=-1)), 1e-12)).reshape(1, v)

    # MXU-aligned tiles, clamped to the (padded) problem so tiny shapes still work.
    tm = min(tm, _round_up(m, 8))
    tn = min(tn, _round_up(v, 128))

    m_pad = _round_up(m, tm)
    v_pad = _round_up(v, tn)
    w = weight
    if m_pad != m:
        x2d = jnp.pad(x2d, ((0, m_pad - m), (0, 0)))
    if v_pad != v:
        w = jnp.pad(w, ((0, v_pad - v), (0, 0)))
        inv_norm = jnp.pad(inv_norm, ((0, 0), (0, v_pad - v)), constant_values=1.0)

    out_dtype = hidden_states.dtype
    itemsize = lambda dt: jnp.dtype(dt).itemsize
    # Double-buffered footprint (x tile, w tile, inv tile, out tile) + headroom.
    bytes_per_step = 2 * (tm * h * itemsize(x2d.dtype)
                          + tn * h * itemsize(w.dtype)
                          + tn * 4
                          + tm * tn * itemsize(out_dtype))
    vmem_limit = int(min(max(2 * bytes_per_step, 32 * 1024 * 1024),
                         120 * 1024 * 1024))

    # Vocab axis OUTERMOST: the (large) weight tile index is constant across the
    # inner M axis, so each weight tile streams from HBM exactly once and is
    # reused for every activation tile.
    grid = (v_pad // tn, m_pad // tm)

    out2d = pl.pallas_call(
        _normhead_kernel,
        out_shape=jax.ShapeDtypeStruct((m_pad, v_pad), out_dtype),
        grid_spec=pltpu.PrefetchScalarGridSpec(
            num_scalar_prefetch=0,
            grid=grid,
            in_specs=[
                pl.BlockSpec((tm, h), lambda j, i: (i, 0)),   # activations
                pl.BlockSpec((tn, h), lambda j, i: (j, 0)),   # raw weight rows
                pl.BlockSpec((1, tn), lambda j, i: (0, j)),   # 1/||w_row||
            ],
            out_specs=pl.BlockSpec((tm, tn), lambda j, i: (i, j)),
        ),
        compiler_params=pltpu.CompilerParams(
            dimension_semantics=("parallel", "parallel"),
            vmem_limit_bytes=vmem_limit),
    )(x2d, w, inv_norm)

    return out2d[:m, :v].reshape(b, s, v)


def _kaiming_uniform(key, shape, a=math.sqrt(5), dtype=jnp.float32):
    # Matches nn.init.kaiming_uniform_(w, a=sqrt(5)) for a [fan_out, fan_in] weight.
    fan_in = shape[1]
    gain = math.sqrt(2.0 / (1.0 + a * a))
    bound = gain * math.sqrt(3.0 / fan_in)
    return jax.random.uniform(key, shape, dtype=dtype, minval=-bound, maxval=bound)


def _reference(hidden_states, weight):
    w = weight.astype(jnp.float32)
    norm = jnp.sqrt(jnp.sum(w * w, axis=-1, keepdims=True))
    w_norm = w / jnp.maximum(norm, 1e-12)
    return jnp.einsum("bsh,vh->bsv", hidden_states.astype(jnp.float32), w_norm)


if __name__ == "__main__":
    key = jax.random.PRNGKey(0)
    k_x, k_w = jax.random.split(key)

    batch, seq, hidden, vocab = 2, 8, 128, 256

    hidden_states = jax.random.normal(k_x, (batch, seq, hidden), dtype=jnp.float32)
    weight = _kaiming_uniform(k_w, (vocab, hidden))  # [vocab_size, hidden_size]

    logits = norm_head(hidden_states, weight)
    logits = jax.block_until_ready(logits)

    ref = _reference(hidden_states, weight)
    assert logits.shape == (batch, seq, vocab)
    assert jnp.allclose(logits, ref.astype(logits.dtype), atol=1e-4, rtol=1e-4)

    print("KERNEL_OK")
</pallas_src>

<mosaic_0001>
module attributes {stable_mosaic.version = 11 : i64} {
  func.func @_normhead_kernel(%arg0: i32, %arg1: i32, %arg2: memref<16x128xf32, #tpu.memory_space<vmem>>, %arg3: memref<256x128xf32, #tpu.memory_space<vmem>>, %arg4: memref<1x256xf32, #tpu.memory_space<vmem>>, %arg5: memref<16x256xf32, #tpu.memory_space<vmem>>) attributes {dimension_semantics = [#tpu.dimension_semantics<parallel>, #tpu.dimension_semantics<parallel>], iteration_bounds = array<i64: 1, 1>, scalar_prefetch = 0 : i64, scratch_operands = 0 : i64, tpu.core_type = #tpu.core_type<tc>, window_params = [{transform_indices = @transform_0, window_bounds = array<i64: 16, 128>}, {transform_indices = @transform_1, window_bounds = array<i64: 256, 128>}, {transform_indices = @transform_2, window_bounds = array<i64: 1, 256>}, {transform_indices = @transform_3, window_bounds = array<i64: 16, 256>}]} {
    %c0 = arith.constant 0 : index
    %c0_0 = arith.constant 0 : index
    %0 = vector.load %arg2[%c0, %c0_0] : memref<16x128xf32, #tpu.memory_space<vmem>>, vector<16x128xf32>
    %c0_1 = arith.constant 0 : index
    %c0_2 = arith.constant 0 : index
    %1 = vector.load %arg3[%c0_1, %c0_2] : memref<256x128xf32, #tpu.memory_space<vmem>>, vector<256x128xf32>
    %cst = arith.constant dense<0.000000e+00> : vector<16x256xf32>
    %2 = tpu.matmul %0, %1, %cst {dimension_numbers = #tpu.dot_dimension_numbers<[1], [1], [0], [0], [0, 0, 1, 0], [], []>} : vector<16x128xf32>, vector<256x128xf32>, vector<16x256xf32> -> vector<16x256xf32>
    %c0_3 = arith.constant 0 : index
    %c0_4 = arith.constant 0 : index
    %3 = vector.load %arg4[%c0_3, %c0_4] : memref<1x256xf32, #tpu.memory_space<vmem>>, vector<1x256xf32>
    %4 = vector.broadcast %3 : vector<1x256xf32> to vector<16x256xf32>
    %5 = arith.mulf %2, %4 : vector<16x256xf32>
    %c0_5 = arith.constant 0 : index
    %c0_6 = arith.constant 0 : index
    %6 = vector.load %arg5[%c0_5, %c0_6] : memref<16x256xf32, #tpu.memory_space<vmem>>, vector<16x256xf32>
    tpu.vector_store %arg5[%c0_5, %c0_6], %5 {strides = array<i32>} : memref<16x256xf32, #tpu.memory_space<vmem>>, vector<16x256xf32>,
    return
  }
  func.func @transform_0(%arg0: i32, %arg1: i32) -> (i32, i32) {
    %c0_i32 = arith.constant 0 : i32
    %c0_i32_0 = arith.constant 0 : i32
    return %arg1, %c0_i32 : i32, i32
  }
  func.func @transform_1(%arg0: i32, %arg1: i32) -> (i32, i32) {
    %c0_i32 = arith.constant 0 : i32
    %c0_i32_0 = arith.constant 0 : i32
    return %arg0, %c0_i32 : i32, i32
  }
  func.func @transform_2(%arg0: i32, %arg1: i32) -> (i32, i32) {
    %c0_i32 = arith.constant 0 : i32
    %c0_i32_0 = arith.constant 0 : i32
    return %c0_i32, %arg0 : i32, i32
  }
  func.func @transform_3(%arg0: i32, %arg1: i32) -> (i32, i32) {
    %c0_i32 = arith.constant 0 : i32
    return %arg1, %arg0 : i32, i32
  }
}

</mosaic_0001>

<bundles_post_ra>
// kernel: tpu_custom_call.1
= control target key start
LH: loop header
LB: loop body
LE: loop exit
PB: predicated region body
PF: predicated region fallthrough
CT: control target
= control target key end

     0   :  { %8 = vsyncpa [#allocation3], 0  ;;  %s421_s0 = inlined_call_operand.hbm [shape: f32[16,128], index: 0, kind: input, shape index: {}]   ;;  %s422_s1 = inlined_call_operand.hbm [shape: f32[256,128], index: 1, kind: input, shape index: {}]   ;;  %s423_s2 = inlined_call_operand.vmem [shape: f32[1,256], index: 2, kind: input, shape index: {}]   ;;  %s424_s3 = inlined_call_operand.hbm [shape: f32[16,256], index: 3, kind: output, shape index: {}]  }
   0x1   :  { %9 = vsyncpa [#allocation6], 0 }
   0x2   :  { %10 = vsyncpa [#allocation4], 0  ;;  %s355_s12 = smov [#allocation2]   ;;  %s283_s16 = scalar_lea.hbm %s421_s0, 256 }
   0x3   :  { %s16_s13 = sshll.u32 %s355_s12, 4  ;;  %p284_p0 = scmp.ne.s32.totalorder %s421_s0, %s283_s16  ;;  %s17_s13 = int_to_ptr.vmem [resolvable:$true] %s16_s13 }
   0x4   :  { %p287_p1 = scmp.lt.u32.totalorder %s283_s16, %s421_s0 }
   0x6   :  { %p289_p2 = pnand %p287_p1, %p284_p0 }
   0x8   :  { %292 = shalt.err (!%p289_p2)
}
   0x9   :  { %s293_s21 = scalar_lea.vmem %s17_s13, 256  ;;  %p298_p4 = scmp.lt.s32.totalorder %s17_s13, %s17_s13 }
   0xa   :  { %p294_p3 = scmp.ne.s32.totalorder %s17_s13, %s293_s21  ;;  %p299_p5 = scmp.lt.s32.totalorder %s293_s21, %s293_s21 }
   0xc   :  { %p300_p6 = por %p299_p5, %p298_p4 }
   0xe   :  { %p301_p7 = pnand %p300_p6, %p294_p3 }
  0x10   :  { %304 = shalt.err (!%p301_p7)
}
  0x11   :  { %s356_s22 = smov 128   ;;  %s357_s23 = smov 8  }
  0x12   :  { %22 = dma.hbm_to_vmem [thread:$0]  %s421_s0, 256, %s17_s13, [#allocation3], %s356_s22, %s356_s22, %s357_s23  }
  0x13   :  { %s358_s26 = smov [#allocation5]   ;;  %s305_s30 = scalar_lea.hbm %s422_s1, 4096 }
  0x14   :  { %s28_s27 = sshll.u32 %s358_s26, 4  ;;  %p306_p8 = scmp.ne.s32.totalorder %s422_s1, %s305_s30  ;;  %s29_s27 = int_to_ptr.vmem [resolvable:$true] %s28_s27 }
  0x15   :  { %p309_p9 = scmp.lt.u32.totalorder %s305_s30, %s422_s1 }
  0x17   :  { %p311_p10 = pnand %p309_p9, %p306_p8 }
  0x19   :  { %314 = shalt.err (!%p311_p10)
}
  0x1a   :  { %s315_s8 = scalar_lea.vmem %s29_s27, 4096  ;;  %p320_p12 = scmp.lt.s32.totalorder %s29_s27, %s29_s27 }
  0x1b   :  { %p316_p11 = scmp.ne.s32.totalorder %s29_s27, %s315_s8  ;;  %p321_p13 = scmp.lt.s32.totalorder %s315_s8, %s315_s8 }
  0x1d   :  { %p322_p0 = por %p321_p13, %p320_p12 }
  0x1f   :  { %p323_p1 = pnand %p322_p0, %p316_p11 }
  0x21   :  { %326 = shalt.err (!%p323_p1)
}
  0x22   :  { %34 = dma.hbm_to_vmem [thread:$0]  %s422_s1, 4096, %s29_s27, [#allocation6], %s356_s22, %s356_s22, %s357_s23  }
  0x23   :  { %349 = dma.done.wait [#allocation3], 256  }
  0x24   :  { %350 = vsyncadd [#allocation3], 4294967040 }
  0x25   :  { %351 = dma.done.wait [#allocation6], 4096  }
  0x26   :  { %352 = vsyncadd [#allocation6], 4294963200  ;;  %v61_v0 = vld [vmem:[#allocation5 + $0x80] sm:$0xff]  ;;  %v62_v1 = vld [vmem:[#allocation5 + $0x88] sm:$0xff]  ;;  %v156_v50 = vlaneseq  ;;  %s359_s11 = smov [#allocation7]  }
  0x27   :  { %v45_v2 = vld [vmem:[#allocation5] sm:$0xff]  ;;  %v228_v3 = vpack.c.bf16 %v62_v1, %v61_v0  ;;  %v46_v4 = vld [vmem:[#allocation5 + $0x8] sm:$0xff]  ;;  %v63_v5 = vld [vmem:[#allocation5 + $0x90] sm:$0xff]  ;;  %s179_s12 = sshll.u32 %s359_s11, 4  ;;  %s180_s12 = int_to_ptr.vmem [resolvable:$true] %s179_s12 }
  0x28   :  { %v64_v6 = vld [vmem:[#allocation5 + $0x98] sm:$0xff]  ;;  %v230_v7 = vpack.c.bf16 %v46_v4, %v45_v2  ;;  %v47_v9 = vld [vmem:[#allocation5 + $0x10] sm:$0xff]  ;;  %v65_v11 = vld [vmem:[#allocation5 + $0xa0] sm:$0xff]  ;;  %v157_v51 = vshrl.u32 %v156_v50, 7  ;;  %s327_s13 = scalar_lea.vmem %s180_s12, 512  ;;  %p332_p3 = scmp.lt.s32.totalorder %s180_s12, %s180_s12 }
  0x29   :  { %v232_v8 = vpack.c.bf16 %v64_v6, %v63_v5  ;;  %229 = vmatprep.subr.bf16.mxu0 %v228_v3  ;;  %260 = vmatprep.subr.bf16.mxu1 %v228_v3  ;;  %v48_v10 = vld [vmem:[#allocation5 + $0x18] sm:$0xff]  ;;  %v66_v12 = vld [vmem:[#allocation5 + $0xa8] sm:$0xff]  ;;  %v43_v15 = vld [vmem:[#allocation2] sm:$0xff]  ;;  %p328_p2 = scmp.ne.s32.totalorder %s180_s12, %s327_s13  ;;  %p333_p4 = scmp.lt.s32.totalorder %s327_s13, %s327_s13 }
  0x2a   :  { %231 = vmatpush3.bf16.xpose.msra.mxu0 %v230_v7  ;;  %268 = vmatpush3.bf16.xpose.msra.mxu1 %v230_v7  ;;  %v234_v13 = vpack.c.bf16 %v48_v10, %v47_v9  ;;  %v236_v14 = vpack.c.bf16 %v66_v12, %v65_v11  ;;  %v44_v16 = vld [vmem:[#allocation2 + $0x8] sm:$0xff]  ;;  %v49_v17 = vld [vmem:[#allocation5 + $0x20] sm:$0xff]  ;;  %v50_v18 = vld [vmem:[#allocation5 + $0x28] sm:$0xff]  ;;  %v158_v52 = vsub.s32 0, %v157_v51  ;;  %v162_v54 = vsub.s32 1, %v157_v51 }
  0x2b   :  { %233 = vmatprep.subr.bf16.mxu0 %v232_v8  ;;  %261 = vmatprep.subr.bf16.mxu1 %v232_v8  ;;  %v67_v19 = vld [vmem:[#allocation5 + $0xb0] sm:$0xff]  ;;  %v68_v20 = vld [vmem:[#allocation5 + $0xb8] sm:$0xff]  ;;  %v238_v21 = vpack.c.bf16 %v50_v18, %v49_v17  ;;  %v69_v25 = vld [vmem:[#allocation5 + $0xc0] sm:$0xff]  ;;  %p334_p5 = por %p333_p4, %p332_p3 }
  0x2c   :  { %224 = vmatprep.mubr.f32.mxu0 %v43_v15  ;;  %226 = vmatprep.mubr.f32.mxu1 %v44_v16  ;;  %v240_v22 = vpack.c.bf16 %v68_v20, %v67_v19  ;;  %v51_v23 = vld [vmem:[#allocation5 + $0x30] sm:$0xff]  ;;  %v52_v24 = vld [vmem:[#allocation5 + $0x38] sm:$0xff]  ;;  %v70_v26 = vld [vmem:[#allocation5 + $0xc8] sm:$0xff] }
  0x2d   :  { %v242_v27 = vpack.c.bf16 %v52_v24, %v51_v23  ;;  %v244_v28 = vpack.c.bf16 %v70_v26, %v69_v25  ;;  %v53_v29 = vld [vmem:[#allocation5 + $0x40] sm:$0xff]  ;;  %v54_v30 = vld [vmem:[#allocation5 + $0x48] sm:$0xff]  ;;  %v71_v31 = vld [vmem:[#allocation5 + $0xd0] sm:$0xff]  ;;  %p335_p6 = pnand %p334_p5, %p328_p2 }
  0x2e   :  { %v72_v32 = vld [vmem:[#allocation5 + $0xd8] sm:$0xff]  ;;  %v246_v33 = vpack.c.bf16 %v54_v30, %v53_v29  ;;  %v55_v35 = vld [vmem:[#allocation5 + $0x50] sm:$0xff]  ;;  %v73_v37 = vld [vmem:[#allocation5 + $0xe0] sm:$0xff] }
  0x2f   :  { %v248_v34 = vpack.c.bf16 %v72_v32, %v71_v31  ;;  %v56_v36 = vld [vmem:[#allocation5 + $0x58] sm:$0xff]  ;;  %v74_v38 = vld [vmem:[#allocation5 + $0xe8] sm:$0xff]  ;;  %v57_v41 = vld [vmem:[#allocation5 + $0x60] sm:$0xff] }
  0x30   :  { %v250_v39 = vpack.c.bf16 %v56_v36, %v55_v35  ;;  %v252_v40 = vpack.c.bf16 %v74_v38, %v73_v37  ;;  %v58_v42 = vld [vmem:[#allocation5 + $0x68] sm:$0xff]  ;;  %v75_v43 = vld [vmem:[#allocation5 + $0xf0] sm:$0xff]  ;;  %v76_v44 = vld [vmem:[#allocation5 + $0xf8] sm:$0xff] }
  0x31   :  { %v254_v45 = vpack.c.bf16 %v58_v42, %v57_v41  ;;  %v256_v46 = vpack.c.bf16 %v76_v44, %v75_v43  ;;  %v59_v47 = vld [vmem:[#allocation5 + $0x70] sm:$0xff]  ;;  %v60_v48 = vld [vmem:[#allocation5 + $0x78] sm:$0xff] }
  0x32   :  { %235 = vmatpush3.bf16.xpose.msra.mxu0 %v234_v13  ;;  %269 = vmatpush3.bf16.xpose.msra.mxu1 %v234_v13  ;;  %v258_v49 = vpack.c.bf16 %v60_v48, %v59_v47  ;;  %v154_v53 = vld [vmem:[%s423_s2] sm:$0x3] }
  0x33   :  { %237 = vmatprep.subr.bf16.mxu0 %v236_v14  ;;  %262 = vmatprep.subr.bf16.mxu1 %v236_v14  ;;  %v159_v55 = vrot.slane %v154_v53, %v158_v52  ;;  %v163_v56 = vrot.slane %v154_v53, %v162_v54 }
  0x3a   :  { %239 = vmatpush3.bf16.xpose.msra.mxu0 %v238_v21  ;;  %270 = vmatpush3.bf16.xpose.msra.mxu1 %v238_v21 }
  0x3b   :  { %241 = vmatprep.subr.bf16.mxu0 %v240_v22  ;;  %263 = vmatprep.subr.bf16.mxu1 %v240_v22 }
  0x42   :  { %243 = vmatpush3.bf16.xpose.msra.mxu0 %v242_v27  ;;  %271 = vmatpush3.bf16.xpose.msra.mxu1 %v242_v27 }
  0x43   :  { %245 = vmatprep.subr.bf16.mxu0 %v244_v28  ;;  %264 = vmatprep.subr.bf16.mxu1 %v244_v28 }
  0x4a   :  { %247 = vmatpush3.bf16.xpose.msra.mxu0 %v246_v33  ;;  %272 = vmatpush3.bf16.xpose.msra.mxu1 %v246_v33 }
  0x4b   :  { %249 = vmatprep.subr.bf16.mxu0 %v248_v34  ;;  %265 = vmatprep.subr.bf16.mxu1 %v248_v34 }
  0x52   :  { %251 = vmatpush3.bf16.xpose.msra.mxu0 %v250_v39  ;;  %273 = vmatpush3.bf16.xpose.msra.mxu1 %v250_v39 }
  0x53   :  { %253 = vmatprep.subr.bf16.mxu0 %v252_v40  ;;  %266 = vmatprep.subr.bf16.mxu1 %v252_v40 }
  0x5a   :  { %255 = vmatpush3.bf16.xpose.msra.mxu0 %v254_v45  ;;  %274 = vmatpush3.bf16.xpose.msra.mxu1 %v254_v45 }
  0x5b   :  { %257 = vmatprep.subr.bf16.mxu0 %v256_v46  ;;  %267 = vmatprep.subr.bf16.mxu1 %v256_v46 }
  0x62   :  { %259 = vmatpush3.bf16.xpose.msra.mxu0 %v258_v49  ;;  %275 = vmatpush3.bf16.xpose.msra.mxu1 %v258_v49 }
  0x69   :  { %225 = vmatmul.mubr.f32.vlgmr.msra.gmra.mrb[0].mxu0 %v43_v15  ;;  %227 = vmatmul.mubr.f32.vlgmr.msra.gmra.mrb[0].mxu1 %v44_v16 }
 0x13c   :  { %v143_v57 = vpop.f32.mrb[0].mxu0  ;;  %v149_v58 = vpop.f32.mrb[0].mxu1 }
 0x13d   :  { %v166_v59 = vmul.f32 %v159_v55, %v143_v57  ;;  %v168_v60 = vmul.f32 %v159_v55, %v149_v58  ;;  %v145_v61 = vpop.f32.mrb[1].mxu0  ;;  %v151_v62 = vpop.f32.mrb[1].mxu1 }
 0x13e   :  { %v167_v63 = vmul.f32 %v163_v56, %v145_v61  ;;  %v169_v0 = vmul.f32 %v163_v56, %v151_v62 }
 0x13f   :  { %170 = vst [vmem:[#allocation7] sm:$0xff] %v166_v59  ;;  %172 = vst [vmem:[#allocation7 + $0x10] sm:$0xff] %v168_v60 }
 0x140   :  { %171 = vst [vmem:[#allocation7 + $0x8] sm:$0xff] %v167_v63  ;;  %173 = vst [vmem:[#allocation7 + $0x18] sm:$0xff] %v169_v0 }
 0x141   :  { %338 = shalt.err (!%p335_p6)
}
 0x142   :  { %s339_s15 = scalar_lea.hbm %s424_s3, 512 }
 0x143   :  { %p340_p7 = scmp.ne.s32.totalorder %s424_s3, %s339_s15  ;;  %p343_p8 = scmp.lt.u32.totalorder %s339_s15, %s424_s3 }
 0x145   :  { %p345_p9 = pnand %p343_p8, %p340_p7 }
 0x147   :  { %348 = shalt.err (!%p345_p9)
}
 0x148   :  { %s360_s20 = smov 256   ;;  %s361_s21 = smov 16  }
 0x149   :  { %185 = dma.vmem_to_hbm [thread:$0]  %s180_s12, 512, %s424_s3, [#allocation4], %s360_s20, %s360_s20, %s361_s21  }
 0x14a   :  { %353 = dma.done.wait [#allocation4], 512  }
 0x14b   :  { %354 = vsyncadd [#allocation4], 4294966784 }
 0x14c   :  { %189 = vsyncpa [#allocation3], 1 }
 0x14d   :  { %190 = vsyncpa [#allocation6], 1 }
 0x14e   :  { %191 = vsyncpa [#allocation4], 1 }

</bundles_post_ra>
